<compile_context>
chip_gen: v7x
topology: tpu7x:2x2x1
jax: 0.10.0
libtpu: 0.0.40
codegen_flags: <defaults>
</compile_context>

<pallas_src>
import jax
import jax.numpy as jnp
from jax.experimental import pallas as pl
from jax.experimental.pallas import tpu as pltpu


def _round_up(x: int, m: int) -> int:
    return ((x + m - 1) // m) * m


def net1_kernel(x_ref, w_ref, b_ref, o_ref):
    # One fused matmul per batch tile: (tile_b, K_pad) @ (K_pad, 128) + bias.
    # Output block is lane-dense (128 wide) -> unmasked full-lane stores.
    o_ref[...] = (
        jnp.dot(x_ref[...], w_ref[...], preferred_element_type=jnp.float32)
        + b_ref[...]
    ).astype(o_ref.dtype)


def net1_forward(x, w1, b1, w2, b2, *, tile_b=1024):
    """Forward pass of Net1: linear2(linear1(x)).

    x:  (B, 1000) float32
    w1: (40, 1000), b1: (40,)   -- PyTorch nn.Linear layout (out_features, in_features)
    w2: (20, 40),   b2: (20,)
    Returns (B, 20) float32.
    """
    B, D_in = x.shape
    H = w1.shape[0]
    D_out = w2.shape[0]
    assert w1.shape == (H, D_in) and w2.shape == (D_out, H)

    # ---- Fold the two bias-linear layers (valid: no nonlinearity between them) ----
    # y = (x @ W1^T + b1) @ W2^T + b2 == x @ (W1^T @ W2^T) + (b1 @ W2^T + b2)
    w12 = jnp.dot(w1.T, w2.T)                          # (1000, 20)
    b12 = jnp.dot(b1[None, :], w2.T) + b2[None, :]     # (1, 20)

    # ---- Padding for lane-dense layout ----
    LANES = 128
    K_pad = _round_up(D_in, LANES)    # 1000 -> 1024 (full vregs along K)
    N_pad = _round_up(D_out, LANES)   # 20   -> 128  (unmasked output stores)

    # Adaptive batch tile: large by default, shrunk for tiny batches, sublane-aligned.
    tile_b = max(8, _round_up(min(int(tile_b), _round_up(B, 8)), 8))
    B_pad = _round_up(B, tile_b)      # replaces the old hard divisibility assert
    grid_b = B_pad // tile_b

    x_p = jnp.zeros((B_pad, K_pad), x.dtype).at[:B, :D_in].set(x)
    w_p = jnp.zeros((K_pad, N_pad), jnp.float32).at[:D_in, :D_out].set(w12)
    b_p = jnp.zeros((1, N_pad), jnp.float32).at[0, :D_out].set(b12[0])

    # ---- VMEM budget: double-buffered x + double-buffered out + resident weight/bias ----
    elt = jnp.dtype(x.dtype).itemsize
    needed = (2 * tile_b * K_pad * elt        # x tiles (double-buffered)
              + 2 * tile_b * N_pad * 4        # output tiles (double-buffered)
              + K_pad * N_pad * 4             # fused weight (resident)
              + N_pad * 4)                    # fused bias
    vmem_limit = int(min(max(2 * needed, 32 * 1024 * 1024), 64 * 1024 * 1024))

    out_p = pl.pallas_call(
        net1_kernel,
        out_shape=jax.ShapeDtypeStruct((B_pad, N_pad), jnp.float32),
        grid_spec=pltpu.PrefetchScalarGridSpec(
            num_scalar_prefetch=0,
            grid=(grid_b,),
            in_specs=[
                pl.BlockSpec((tile_b, K_pad), lambda i: (i, 0)),   # x tile (streams from HBM)
                pl.BlockSpec((K_pad, N_pad), lambda i: (0, 0)),    # fused weight (resident)
                pl.BlockSpec((1, N_pad), lambda i: (0, 0)),        # fused bias (resident)
            ],
            out_specs=pl.BlockSpec((tile_b, N_pad), lambda i: (i, 0)),
        ),
        compiler_params=pltpu.CompilerParams(
            dimension_semantics=("parallel",),     # batch axis -> megacore sharding on v7x
            vmem_limit_bytes=vmem_limit,
        ),
    )(x_p, w_p, b_p)

    # Strip batch and lane padding.
    return out_p[:B, :D_out]


if __name__ == "__main__":
    key = jax.random.PRNGKey(0)
    k_x, k_w1, k_b1, k_w2, k_b2, k_x2 = jax.random.split(key, 6)

    D_IN, H, D_OUT = 1000, 40, 20

    # PyTorch-style init: uniform(-1/sqrt(fan_in), 1/sqrt(fan_in)), nn.Linear layout (out, in).
    bound1 = 1.0 / jnp.sqrt(D_IN)
    bound2 = 1.0 / jnp.sqrt(H)
    w1 = jax.random.uniform(k_w1, (H, D_IN), jnp.float32, -bound1, bound1)
    b1 = jax.random.uniform(k_b1, (H,), jnp.float32, -bound1, bound1)
    w2 = jax.random.uniform(k_w2, (D_OUT, H), jnp.float32, -bound2, bound2)
    b2 = jax.random.uniform(k_b2, (D_OUT,), jnp.float32, -bound2, bound2)

    def ref_forward(x):
        # Unfused pure-JAX reference, same math as the PyTorch module.
        return (x @ w1.T + b1) @ w2.T + b2

    # Small batch (multiple of 8).
    B = 8
    x = jax.random.normal(k_x, (B, D_IN), jnp.float32)
    out = jax.block_until_ready(net1_forward(x, w1, b1, w2, b2))
    assert out.shape == (B, D_OUT)
    assert jnp.allclose(out, ref_forward(x), atol=1e-4, rtol=1e-4)

    # Odd batch exercises the cdiv/zero-pad path (no divisibility assert anymore).
    B2 = 13
    x2 = jax.random.normal(k_x2, (B2, D_IN), jnp.float32)
    out2 = jax.block_until_ready(net1_forward(x2, w1, b1, w2, b2))
    assert out2.shape == (B2, D_OUT)
    assert jnp.allclose(out2, ref_forward(x2), atol=1e-4, rtol=1e-4)

    print("KERNEL_OK")
</pallas_src>

<mosaic_0001>
module attributes {stable_mosaic.version = 11 : i64} {
  func.func @net1_kernel(%arg0: i32, %arg1: memref<8x1024xf32, #tpu.memory_space<vmem>>, %arg2: memref<1024x128xf32, #tpu.memory_space<vmem>>, %arg3: memref<1x128xf32, #tpu.memory_space<vmem>>, %arg4: memref<8x128xf32, #tpu.memory_space<vmem>>) attributes {dimension_semantics = [#tpu.dimension_semantics<parallel>], iteration_bounds = array<i64: 1>, scalar_prefetch = 0 : i64, scratch_operands = 0 : i64, tpu.core_type = #tpu.core_type<tc>, window_params = [{transform_indices = @transform_0, window_bounds = array<i64: 8, 1024>}, {pipeline_mode = #tpu.pipeline_mode<synchronous>, transform_indices = @transform_1, window_bounds = array<i64: 1024, 128>}, {pipeline_mode = #tpu.pipeline_mode<synchronous>, transform_indices = @transform_2, window_bounds = array<i64: 1, 128>}, {transform_indices = @transform_3, window_bounds = array<i64: 8, 128>}]} {
    %c0 = arith.constant 0 : index
    %c0_0 = arith.constant 0 : index
    %0 = vector.load %arg1[%c0, %c0_0] : memref<8x1024xf32, #tpu.memory_space<vmem>>, vector<8x1024xf32>
    %c0_1 = arith.constant 0 : index
    %c0_2 = arith.constant 0 : index
    %1 = vector.load %arg2[%c0_1, %c0_2] : memref<1024x128xf32, #tpu.memory_space<vmem>>, vector<1024x128xf32>
    %cst = arith.constant dense<0.000000e+00> : vector<8x128xf32>
    %2 = tpu.matmul %0, %1, %cst {dimension_numbers = #tpu.dot_dimension_numbers<[1], [0], [0], [1], [0, 0, 1, 1], [], []>} : vector<8x1024xf32>, vector<1024x128xf32>, vector<8x128xf32> -> vector<8x128xf32>
    %c0_3 = arith.constant 0 : index
    %c0_4 = arith.constant 0 : index
    %3 = vector.load %arg3[%c0_3, %c0_4] : memref<1x128xf32, #tpu.memory_space<vmem>>, vector<1x128xf32>
    %4 = vector.broadcast %3 : vector<1x128xf32> to vector<8x128xf32>
    %5 = arith.addf %2, %4 : vector<8x128xf32>
    %c0_5 = arith.constant 0 : index
    %c0_6 = arith.constant 0 : index
    %6 = vector.load %arg4[%c0_5, %c0_6] : memref<8x128xf32, #tpu.memory_space<vmem>>, vector<8x128xf32>
    tpu.vector_store %arg4[%c0_5, %c0_6], %5 {strides = array<i32>} : memref<8x128xf32, #tpu.memory_space<vmem>>, vector<8x128xf32>,
    return
  }
  func.func @transform_0(%arg0: i32) -> (i32, i32) {
    %c0_i32 = arith.constant 0 : i32
    %c0_i32_0 = arith.constant 0 : i32
    return %arg0, %c0_i32 : i32, i32
  }
  func.func @transform_1(%arg0: i32) -> (i32, i32) {
    %c0_i32 = arith.constant 0 : i32
    %c0_i32_0 = arith.constant 0 : i32
    %c0_i32_1 = arith.constant 0 : i32
    return %c0_i32, %c0_i32_0 : i32, i32
  }
  func.func @transform_2(%arg0: i32) -> (i32, i32) {
    %c0_i32 = arith.constant 0 : i32
    %c0_i32_0 = arith.constant 0 : i32
    %c0_i32_1 = arith.constant 0 : i32
    return %c0_i32, %c0_i32_0 : i32, i32
  }
  func.func @transform_3(%arg0: i32) -> (i32, i32) {
    %c0_i32 = arith.constant 0 : i32
    %c0_i32_0 = arith.constant 0 : i32
    return %arg0, %c0_i32 : i32, i32
  }
}

</mosaic_0001>

<bundles_post_ra>
// kernel: tpu_custom_call.1
= control target key start
LH: loop header
LB: loop body
LE: loop exit
PB: predicated region body
PF: predicated region fallthrough
CT: control target
= control target key end

     0   :  { %8 = vsyncpa [#allocation3], 0  ;;  %s898_s0 = inlined_call_operand.hbm [shape: f32[8,1024], index: 0, kind: input, shape index: {}]   ;;  %s899_s1 = inlined_call_operand.hbm [shape: f32[1024,128], index: 1, kind: input, shape index: {}]   ;;  %s900_s2 = inlined_call_operand.vmem [shape: f32[1,128], index: 2, kind: input, shape index: {}]   ;;  %s901_s3 = inlined_call_operand.hbm [shape: f32[8,128], index: 3, kind: output, shape index: {}]  }
   0x1   :  { %9 = vsyncpa [#allocation6], 0 }
   0x2   :  { %10 = vsyncpa [#allocation4], 0  ;;  %s827_s12 = smov [#allocation2]   ;;  %s828_s14 = smov [#allocation5]  }
   0x3   :  { %s17_s13 = sshll.u32 %s827_s12, 4  ;;  %s26_s15 = sshll.u32 %s828_s14, 4  ;;  %s18_s13 = int_to_ptr.vmem [resolvable:$true] %s17_s13  ;;  %s852_s15 = int_to_ptr.vmem [resolvable:$true] %s26_s15 }
   0x4   :  { %s755_s18 = scalar_lea.hbm %s898_s0, 1024 }
   0x5   :  { %p756_p0 = scmp.ne.s32.totalorder %s898_s0, %s755_s18  ;;  %p759_p1 = scmp.lt.u32.totalorder %s755_s18, %s898_s0 }
   0x7   :  { %p761_p2 = pnand %p759_p1, %p756_p0 }
   0x9   :  { %764 = shalt.err (!%p761_p2)
}
   0xa   :  { %s765_s23 = scalar_lea.vmem %s18_s13, 1024  ;;  %p770_p4 = scmp.lt.s32.totalorder %s18_s13, %s18_s13 }
   0xb   :  { %p766_p3 = scmp.ne.s32.totalorder %s18_s13, %s765_s23  ;;  %p771_p5 = scmp.lt.s32.totalorder %s765_s23, %s765_s23 }
   0xd   :  { %p772_p6 = por %p771_p5, %p770_p4 }
   0xf   :  { %p773_p7 = pnand %p772_p6, %p766_p3 }
  0x11   :  { %776 = shalt.err (!%p773_p7)
}
  0x12   :  { %20 = dma.hbm_to_vmem [thread:$0]  %s898_s0, 1024, %s18_s13, [#allocation3]  }
  0x13   :  { %s777_s28 = scalar_lea.hbm %s899_s1, 16384 }
  0x14   :  { %p778_p8 = scmp.ne.s32.totalorder %s899_s1, %s777_s28  ;;  %p781_p9 = scmp.lt.u32.totalorder %s777_s28, %s899_s1 }
  0x16   :  { %p783_p10 = pnand %p781_p9, %p778_p8 }
  0x18   :  { %786 = shalt.err (!%p783_p10)
}
  0x19   :  { %s787_s6 = scalar_lea.vmem %s852_s15, 16384  ;;  %p792_p12 = scmp.lt.s32.totalorder %s852_s15, %s852_s15 }
  0x1a   :  { %p788_p11 = scmp.ne.s32.totalorder %s852_s15, %s787_s6  ;;  %p793_p13 = scmp.lt.s32.totalorder %s787_s6, %s787_s6 }
  0x1c   :  { %p794_p0 = por %p793_p13, %p792_p12 }
  0x1e   :  { %p795_p1 = pnand %p794_p0, %p788_p11 }
  0x20   :  { %798 = shalt.err (!%p795_p1)
}
  0x21   :  { %s829_s0 = smov 128   ;;  %s830_s7 = smov 8  }
  0x22   :  { %32 = dma.hbm_to_vmem [thread:$0]  %s899_s1, 16384, %s852_s15, [#allocation6], %s829_s0, %s829_s0, %s830_s7  }
  0x23   :  { %821 = dma.done.wait [#allocation3], 1024  }
  0x24   :  { %822 = vsyncadd [#allocation3], 4294966272 }
  0x25   :  { %823 = dma.done.wait [#allocation6], 16384  }
  0x26   :  { %824 = vsyncadd [#allocation6], 4294950912  ;;  %v65_v0 = vld [vmem:[#allocation5 + $0x80] sm:$0xff]  ;;  %v66_v1 = vld [vmem:[#allocation5 + $0x88] sm:$0xff]  ;;  %s831_s11 = smov [#allocation7]  }
  0x27   :  { %v49_v2 = vld [vmem:[#allocation5] sm:$0xff]  ;;  %v622_v3 = vpack.c.bf16 %v66_v1, %v65_v0  ;;  %v50_v4 = vld [vmem:[#allocation5 + $0x8] sm:$0xff]  ;;  %v67_v11 = vld [vmem:[#allocation5 + $0x90] sm:$0xff]  ;;  %s471_s12 = sshll.u32 %s831_s11, 4  ;;  %s472_s12 = int_to_ptr.vmem [resolvable:$true] %s471_s12 }
  0x28   :  { %v97_v5 = vld [vmem:[#allocation5 + $0x180] sm:$0xff]  ;;  %v98_v6 = vld [vmem:[#allocation5 + $0x188] sm:$0xff]  ;;  %v624_v7 = vpack.c.bf16 %v50_v4, %v49_v2  ;;  %v68_v13 = vld [vmem:[#allocation5 + $0x98] sm:$0xff]  ;;  %p804_p3 = scmp.lt.s32.totalorder %s472_s12, %s472_s12 }
  0x29   :  { %v654_v8 = vpack.c.bf16 %v98_v6, %v97_v5  ;;  %v81_v9 = vld [vmem:[#allocation5 + $0x100] sm:$0xff]  ;;  %v82_v10 = vld [vmem:[#allocation5 + $0x108] sm:$0xff]  ;;  %623 = vmatprep.subr.bf16.mxu0 %v622_v3  ;;  %v51_v14 = vld [vmem:[#allocation5 + $0x10] sm:$0xff]  ;;  %v626_v16 = vpack.c.bf16 %v68_v13, %v67_v11 }
  0x2a   :  { %v656_v12 = vpack.c.bf16 %v82_v10, %v81_v9  ;;  %v52_v15 = vld [vmem:[#allocation5 + $0x18] sm:$0xff]  ;;  %625 = vmatpush3.bf16.msra.mxu0 %v624_v7  ;;  %v99_v18 = vld [vmem:[#allocation5 + $0x190] sm:$0xff]  ;;  %v69_v23 = vld [vmem:[#allocation5 + $0xa0] sm:$0xff] }
  0x2b   :  { %655 = vmatprep.subr.bf16.mxu1 %v654_v8  ;;  %v628_v17 = vpack.c.bf16 %v52_v15, %v51_v14  ;;  %v100_v19 = vld [vmem:[#allocation5 + $0x198] sm:$0xff]  ;;  %v83_v20 = vld [vmem:[#allocation5 + $0x110] sm:$0xff]  ;;  %v70_v24 = vld [vmem:[#allocation5 + $0xa8] sm:$0xff]  ;;  %627 = vmatprep.subr.bf16.mxu0 %v626_v16 }
  0x2c   :  { %657 = vmatpush3.bf16.msra.mxu1 %v656_v12  ;;  %v658_v21 = vpack.c.bf16 %v100_v19, %v99_v18  ;;  %v84_v22 = vld [vmem:[#allocation5 + $0x118] sm:$0xff]  ;;  %v630_v26 = vpack.c.bf16 %v70_v24, %v69_v23  ;;  %v53_v27 = vld [vmem:[#allocation5 + $0x20] sm:$0xff]  ;;  %v54_v28 = vld [vmem:[#allocation5 + $0x28] sm:$0xff] }
  0x2d   :  { %v660_v25 = vpack.c.bf16 %v84_v22, %v83_v20  ;;  %v101_v29 = vld [vmem:[#allocation5 + $0x1a0] sm:$0xff]  ;;  %v102_v30 = vld [vmem:[#allocation5 + $0x1a8] sm:$0xff]  ;;  %v632_v33 = vpack.c.bf16 %v54_v28, %v53_v27  ;;  %v71_v35 = vld [vmem:[#allocation5 + $0xb0] sm:$0xff] }
  0x2e   :  { %659 = vmatprep.subr.bf16.mxu1 %v658_v21  ;;  %v85_v31 = vld [vmem:[#allocation5 + $0x120] sm:$0xff]  ;;  %v86_v32 = vld [vmem:[#allocation5 + $0x128] sm:$0xff]  ;;  %629 = vmatpush3.bf16.msra.mxu0 %v628_v17  ;;  %v662_v34 = vpack.c.bf16 %v102_v30, %v101_v29  ;;  %v72_v36 = vld [vmem:[#allocation5 + $0xb8] sm:$0xff] }
  0x2f   :  { %v55_v37 = vld [vmem:[#allocation5 + $0x30] sm:$0xff]  ;;  %631 = vmatprep.subr.bf16.mxu0 %v630_v26  ;;  %v664_v38 = vpack.c.bf16 %v86_v32, %v85_v31  ;;  %v634_v39 = vpack.c.bf16 %v72_v36, %v71_v35  ;;  %v56_v40 = vld [vmem:[#allocation5 + $0x38] sm:$0xff]  ;;  %v73_v46 = vld [vmem:[#allocation5 + $0xc0] sm:$0xff] }
  0x30   :  { %661 = vmatpush3.bf16.msra.mxu1 %v660_v25  ;;  %v103_v41 = vld [vmem:[#allocation5 + $0x1b0] sm:$0xff]  ;;  %v104_v42 = vld [vmem:[#allocation5 + $0x1b8] sm:$0xff]  ;;  %v74_v47 = vld [vmem:[#allocation5 + $0xc8] sm:$0xff]  ;;  %v636_v48 = vpack.c.bf16 %v56_v40, %v55_v37 }
  0x31   :  { %663 = vmatprep.subr.bf16.mxu1 %v662_v34  ;;  %v666_v43 = vpack.c.bf16 %v104_v42, %v103_v41  ;;  %v87_v44 = vld [vmem:[#allocation5 + $0x130] sm:$0xff]  ;;  %v88_v45 = vld [vmem:[#allocation5 + $0x138] sm:$0xff]  ;;  %v105_v49 = vld [vmem:[#allocation5 + $0x1c0] sm:$0xff]  ;;  %v638_v52 = vpack.c.bf16 %v74_v47, %v73_v46 }
  0x32   :  { %633 = vmatpush3.bf16.msra.mxu0 %v632_v33  ;;  %v106_v50 = vld [vmem:[#allocation5 + $0x1c8] sm:$0xff]  ;;  %v668_v51 = vpack.c.bf16 %v88_v45, %v87_v44  ;;  %v57_v53 = vld [vmem:[#allocation5 + $0x40] sm:$0xff]  ;;  %v75_v58 = vld [vmem:[#allocation5 + $0xd0] sm:$0xff] }
  0x33   :  { %635 = vmatprep.subr.bf16.mxu0 %v634_v39  ;;  %v58_v54 = vld [vmem:[#allocation5 + $0x48] sm:$0xff]  ;;  %v89_v55 = vld [vmem:[#allocation5 + $0x140] sm:$0xff]  ;;  %v670_v56 = vpack.c.bf16 %v106_v50, %v105_v49  ;;  %v76_v59 = vld [vmem:[#allocation5 + $0xd8] sm:$0xff] }
  0x34   :  { %665 = vmatpush3.bf16.msra.mxu1 %v664_v38  ;;  %v90_v57 = vld [vmem:[#allocation5 + $0x148] sm:$0xff]  ;;  %v107_v60 = vld [vmem:[#allocation5 + $0x1d0] sm:$0xff]  ;;  %v108_v61 = vld [vmem:[#allocation5 + $0x1d8] sm:$0xff]  ;;  %v640_v62 = vpack.c.bf16 %v58_v54, %v57_v53  ;;  %v642_v0 = vpack.c.bf16 %v76_v59, %v75_v58 }
  0x35   :  { %667 = vmatprep.subr.bf16.mxu1 %v666_v43  ;;  %v672_v63 = vpack.c.bf16 %v90_v57, %v89_v55  ;;  %v59_v1 = vld [vmem:[#allocation5 + $0x50] sm:$0xff]  ;;  %v60_v2 = vld [vmem:[#allocation5 + $0x58] sm:$0xff]  ;;  %v674_v4 = vpack.c.bf16 %v108_v61, %v107_v60  ;;  %v77_v6 = vld [vmem:[#allocation5 + $0xe0] sm:$0xff] }
  0x36   :  { %637 = vmatpush3.bf16.msra.mxu0 %v636_v48  ;;  %v91_v3 = vld [vmem:[#allocation5 + $0x150] sm:$0xff]  ;;  %v92_v5 = vld [vmem:[#allocation5 + $0x158] sm:$0xff]  ;;  %v78_v7 = vld [vmem:[#allocation5 + $0xe8] sm:$0xff]  ;;  %v644_v10 = vpack.c.bf16 %v60_v2, %v59_v1 }
  0x37   :  { %639 = vmatprep.subr.bf16.mxu0 %v638_v52  ;;  %v109_v8 = vld [vmem:[#allocation5 + $0x1e0] sm:$0xff]  ;;  %v110_v9 = vld [vmem:[#allocation5 + $0x1e8] sm:$0xff]  ;;  %v676_v13 = vpack.c.bf16 %v92_v5, %v91_v3  ;;  %v646_v14 = vpack.c.bf16 %v78_v7, %v77_v6  ;;  %v79_v19 = vld [vmem:[#allocation5 + $0xf0] sm:$0xff] }
  0x38   :  { %669 = vmatpush3.bf16.msra.mxu1 %v668_v51  ;;  %v61_v11 = vld [vmem:[#allocation5 + $0x60] sm:$0xff]  ;;  %v62_v12 = vld [vmem:[#allocation5 + $0x68] sm:$0xff]  ;;  %v678_v18 = vpack.c.bf16 %v110_v9, %v109_v8  ;;  %v80_v20 = vld [vmem:[#allocation5 + $0xf8] sm:$0xff] }
  0x39   :  { %671 = vmatprep.subr.bf16.mxu1 %v670_v56  ;;  %v93_v15 = vld [vmem:[#allocation5 + $0x160] sm:$0xff]  ;;  %v94_v16 = vld [vmem:[#allocation5 + $0x168] sm:$0xff]  ;;  %v44_v21 = vld [vmem:[#allocation2 + $0x18] sm:$0xff]  ;;  %v648_v24 = vpack.c.bf16 %v62_v12, %v61_v11  ;;  %v650_v26 = vpack.c.bf16 %v80_v20, %v79_v19 }
  0x3a   :  { %641 = vmatpush3.bf16.msra.mxu0 %v640_v62  ;;  %v42_v17 = vld [vmem:[#allocation2 + $0x8] sm:$0xff]  ;;  %v111_v22 = vld [vmem:[#allocation5 + $0x1f0] sm:$0xff]  ;;  %v112_v23 = vld [vmem:[#allocation5 + $0x1f8] sm:$0xff]  ;;  %318 = vmatprep.mubr.f32.mxu1 %v44_v21  ;;  %v680_v25 = vpack.c.bf16 %v94_v16, %v93_v15 }
  0x3b   :  { %643 = vmatprep.subr.bf16.mxu0 %v642_v0  ;;  %248 = vmatprep.mubr.f32.mxu0 %v42_v17  ;;  %v63_v27 = vld [vmem:[#allocation5 + $0x70] sm:$0xff]  ;;  %v64_v28 = vld [vmem:[#allocation5 + $0x78] sm:$0xff]  ;;  %v682_v30 = vpack.c.bf16 %v112_v23, %v111_v22  ;;  %v129_v32 = vld [vmem:[#allocation5 + $0x280] sm:$0xff] }
  0x3c   :  { %673 = vmatpush3.bf16.msra.mxu1 %v672_v63  ;;  %v95_v29 = vld [vmem:[#allocation5 + $0x170] sm:$0xff]  ;;  %v96_v31 = vld [vmem:[#allocation5 + $0x178] sm:$0xff]  ;;  %v130_v33 = vld [vmem:[#allocation5 + $0x288] sm:$0xff]  ;;  %v652_v36 = vpack.c.bf16 %v64_v28, %v63_v27 }
  0x3d   :  { %675 = vmatprep.subr.bf16.mxu1 %v674_v4  ;;  %v161_v34 = vld [vmem:[#allocation5 + $0x380] sm:$0xff]  ;;  %v162_v35 = vld [vmem:[#allocation5 + $0x388] sm:$0xff]  ;;  %v684_v37 = vpack.c.bf16 %v96_v31, %v95_v29  ;;  %v686_v38 = vpack.c.bf16 %v130_v33, %v129_v32  ;;  %v131_v44 = vld [vmem:[#allocation5 + $0x290] sm:$0xff] }
  0x3e   :  { %645 = vmatpush3.bf16.msra.mxu0 %v644_v10  ;;  %v113_v39 = vld [vmem:[#allocation5 + $0x200] sm:$0xff]  ;;  %v114_v40 = vld [vmem:[#allocation5 + $0x208] sm:$0xff]  ;;  %v718_v42 = vpack.c.bf16 %v162_v35, %v161_v34  ;;  %v132_v45 = vld [vmem:[#allocation5 + $0x298] sm:$0xff] }
  0x3f   :  { %647 = vmatprep.subr.bf16.mxu0 %v646_v14  ;;  %v145_v41 = vld [vmem:[#allocation5 + $0x300] sm:$0xff]  ;;  %v146_v43 = vld [vmem:[#allocation5 + $0x308] sm:$0xff]  ;;  %v163_v46 = vld [vmem:[#allocation5 + $0x390] sm:$0xff]  ;;  %v688_v49 = vpack.c.bf16 %v114_v40, %v113_v39  ;;  %v690_v52 = vpack.c.bf16 %v132_v45, %v131_v44 }
  0x40   :  { %677 = vmatpush3.bf16.msra.mxu1 %v676_v13  ;;  %v164_v47 = vld [vmem:[#allocation5 + $0x398] sm:$0xff]  ;;  %v41_v48 = vld [vmem:[#allocation2] sm:$0xff]  ;;  %v43_v50 = vld [vmem:[#allocation2 + $0x10] sm:$0xff]  ;;  %v720_v51 = vpack.c.bf16 %v146_v43, %v145_v41 }
  0x41   :  { %679 = vmatprep.subr.bf16.mxu1 %v678_v18  ;;  %v115_v53 = vld [vmem:[#allocation5 + $0x210] sm:$0xff]  ;;  %v116_v54 = vld [vmem:[#allocation5 + $0x218] sm:$0xff]  ;;  %v722_v56 = vpack.c.bf16 %v164_v47, %v163_v46  ;;  %v133_v58 = vld [vmem:[#allocation5 + $0x2a0] sm:$0xff] }
  0x42   :  { %649 = vmatpush3.bf16.msra.mxu0 %v648_v24  ;;  %v147_v55 = vld [vmem:[#allocation5 + $0x310] sm:$0xff]  ;;  %v148_v57 = vld [vmem:[#allocation5 + $0x318] sm:$0xff]  ;;  %v134_v59 = vld [vmem:[#allocation5 + $0x2a8] sm:$0xff]  ;;  %v692_v62 = vpack.c.bf16 %v116_v54, %v115_v53 }
  0x43   :  { %651 = vmatprep.subr.bf16.mxu0 %v650_v26  ;;  %v165_v60 = vld [vmem:[#allocation5 + $0x3a0] sm:$0xff]  ;;  %v166_v61 = vld [vmem:[#allocation5 + $0x3a8] sm:$0xff]  ;;  %v724_v63 = vpack.c.bf16 %v148_v57, %v147_v55  ;;  %v694_v0 = vpack.c.bf16 %v134_v59, %v133_v58  ;;  %v135_v6 = vld [vmem:[#allocation5 + $0x2b0] sm:$0xff] }
  0x44   :  { %681 = vmatpush3.bf16.msra.mxu1 %v680_v25  ;;  %v117_v1 = vld [vmem:[#allocation5 + $0x220] sm:$0xff]  ;;  %v118_v2 = vld [vmem:[#allocation5 + $0x228] sm:$0xff]  ;;  %v726_v4 = vpack.c.bf16 %v166_v61, %v165_v60  ;;  %v136_v7 = vld [vmem:[#allocation5 + $0x2b8] sm:$0xff] }
  0x45   :  { %683 = vmatprep.subr.bf16.mxu1 %v682_v30  ;;  %v149_v3 = vld [vmem:[#allocation5 + $0x320] sm:$0xff]  ;;  %v150_v5 = vld [vmem:[#allocation5 + $0x328] sm:$0xff]  ;;  %v167_v8 = vld [vmem:[#allocation5 + $0x3b0] sm:$0xff]  ;;  %v696_v10 = vpack.c.bf16 %v118_v2, %v117_v1  ;;  %v698_v12 = vpack.c.bf16 %v136_v7, %v135_v6 }
  0x46   :  { %653 = vmatpush3.bf16.msra.mxu0 %v652_v36  ;;  %v168_v9 = vld [vmem:[#allocation5 + $0x3b8] sm:$0xff]  ;;  %v728_v11 = vpack.c.bf16 %v150_v5, %v149_v3  ;;  %v119_v13 = vld [vmem:[#allocation5 + $0x230] sm:$0xff]  ;;  %v137_v18 = vld [vmem:[#allocation5 + $0x2c0] sm:$0xff] }
  0x47   :  { %687 = vmatprep.subr.bf16.mxu0 %v686_v38  ;;  %v120_v14 = vld [vmem:[#allocation5 + $0x238] sm:$0xff]  ;;  %v151_v15 = vld [vmem:[#allocation5 + $0x330] sm:$0xff]  ;;  %v730_v16 = vpack.c.bf16 %v168_v9, %v167_v8  ;;  %v138_v19 = vld [vmem:[#allocation5 + $0x2c8] sm:$0xff] }
  0x48   :  { %685 = vmatpush3.bf16.msra.mxu1 %v684_v37  ;;  %v152_v17 = vld [vmem:[#allocation5 + $0x338] sm:$0xff]  ;;  %v169_v20 = vld [vmem:[#allocation5 + $0x3c0] sm:$0xff]  ;;  %v170_v21 = vld [vmem:[#allocation5 + $0x3c8] sm:$0xff]  ;;  %v700_v22 = vpack.c.bf16 %v120_v14, %v119_v13  ;;  %v702_v26 = vpack.c.bf16 %v138_v19, %v137_v18 }
  0x49   :  { %719 = vmatprep.subr.bf16.mxu1 %v718_v42  ;;  %249 = vmatmul.mubr.f32.vlgmr.msra.gmra.mrb[0].mxu0 %v41_v48  ;;  %v46_v23 = vld [vmem:[#allocation2 + $0x28] sm:$0xff]  ;;  %v48_v24 = vld [vmem:[#allocation2 + $0x38] sm:$0xff]  ;;  %v732_v25 = vpack.c.bf16 %v152_v17, %v151_v15  ;;  %v121_v27 = vld [vmem:[#allocation5 + $0x240] sm:$0xff]  ;;  %v734_v30 = vpack.c.bf16 %v170_v21, %v169_v20 }
  0x4a   :  { %689 = vmatpush3.bf16.msra.mxu0 %v688_v49  ;;  %v122_v28 = vld [vmem:[#allocation5 + $0x248] sm:$0xff]  ;;  %v153_v29 = vld [vmem:[#allocation5 + $0x340] sm:$0xff]  ;;  %v139_v32 = vld [vmem:[#allocation5 + $0x2d0] sm:$0xff]  ;;  %388 = vmatprep.mubr.f32.mxu0 %v46_v23 }
  0x4b   :  { %319 = vmatmul.mubr.f32.vlgmr.msra.gmra.mrb[0].mxu1 %v43_v50  ;;  %691 = vmatprep.subr.bf16.mxu0 %v690_v52  ;;  %v154_v31 = vld [vmem:[#allocation5 + $0x348] sm:$0xff]  ;;  %v140_v33 = vld [vmem:[#allocation5 + $0x2d8] sm:$0xff]  ;;  %v171_v34 = vld [vmem:[#allocation5 + $0x3d0] sm:$0xff]  ;;  %v704_v36 = vpack.c.bf16 %v122_v28, %v121_v27 }
  0x4c   :  { %721 = vmatpush3.bf16.msra.mxu1 %v720_v51  ;;  %v172_v35 = vld [vmem:[#allocation5 + $0x3d8] sm:$0xff]  ;;  %458 = vmatprep.mubr.f32.mxu1 %v48_v24  ;;  %v736_v37 = vpack.c.bf16 %v154_v31, %v153_v29  ;;  %v706_v38 = vpack.c.bf16 %v140_v33, %v139_v32  ;;  %v123_v39 = vld [vmem:[#allocation5 + $0x250] sm:$0xff]  ;;  %v141_v44 = vld [vmem:[#allocation5 + $0x2e0] sm:$0xff] }
  0x4d   :  { %723 = vmatprep.subr.bf16.mxu1 %v722_v56  ;;  %v124_v40 = vld [vmem:[#allocation5 + $0x258] sm:$0xff]  ;;  %v155_v41 = vld [vmem:[#allocation5 + $0x350] sm:$0xff]  ;;  %v738_v42 = vpack.c.bf16 %v172_v35, %v171_v34  ;;  %v142_v45 = vld [vmem:[#allocation5 + $0x2e8] sm:$0xff] }
  0x4e   :  { %693 = vmatpush3.bf16.msra.mxu0 %v692_v62  ;;  %v156_v43 = vld [vmem:[#allocation5 + $0x358] sm:$0xff]  ;;  %v173_v46 = vld [vmem:[#allocation5 + $0x3e0] sm:$0xff]  ;;  %v174_v47 = vld [vmem:[#allocation5 + $0x3e8] sm:$0xff]  ;;  %v708_v48 = vpack.c.bf16 %v124_v40, %v123_v39  ;;  %v710_v50 = vpack.c.bf16 %v142_v45, %v141_v44 }
  0x4f   :  { %695 = vmatprep.subr.bf16.mxu0 %v694_v0  ;;  %v740_v49 = vpack.c.bf16 %v156_v43, %v155_v41  ;;  %v125_v51 = vld [vmem:[#allocation5 + $0x260] sm:$0xff]  ;;  %v126_v52 = vld [vmem:[#allocation5 + $0x268] sm:$0xff]  ;;  %v742_v54 = vpack.c.bf16 %v174_v47, %v173_v46  ;;  %v143_v56 = vld [vmem:[#allocation5 + $0x2f0] sm:$0xff] }
  0x50   :  { %725 = vmatpush3.bf16.msra.mxu1 %v724_v63  ;;  %v157_v53 = vld [vmem:[#allocation5 + $0x360] sm:$0xff]  ;;  %v158_v55 = vld [vmem:[#allocation5 + $0x368] sm:$0xff]  ;;  %v144_v57 = vld [vmem:[#allocation5 + $0x2f8] sm:$0xff]  ;;  %v712_v60 = vpack.c.bf16 %v126_v52, %v125_v51 }
  0x51   :  { %727 = vmatprep.subr.bf16.mxu1 %v726_v4  ;;  %v175_v58 = vld [vmem:[#allocation5 + $0x3f0] sm:$0xff]  ;;  %v176_v59 = vld [vmem:[#allocation5 + $0x3f8] sm:$0xff]  ;;  %v744_v61 = vpack.c.bf16 %v158_v55, %v157_v53  ;;  %v714_v62 = vpack.c.bf16 %v144_v57, %v143_v56  ;;  %v45_v6 = vld [vmem:[#allocation2 + $0x20] sm:$0xff] }
  0x52   :  { %697 = vmatpush3.bf16.msra.mxu0 %v696_v10  ;;  %v127_v63 = vld [vmem:[#allocation5 + $0x270] sm:$0xff]  ;;  %v128_v0 = vld [vmem:[#allocation5 + $0x278] sm:$0xff]  ;;  %v746_v1 = vpack.c.bf16 %v176_v59, %v175_v58  ;;  %v481_v9 = vld [vmem:[%s900_s2] ss:$0 sm:$0xff]  ;;  %s799_s2 = scalar_lea.vmem %s472_s12, 128 }
  0x53   :  { %699 = vmatprep.subr.bf16.mxu0 %v698_v12  ;;  %v159_v2 = vld [vmem:[#allocation5 + $0x370] sm:$0xff]  ;;  %v160_v3 = vld [vmem:[#allocation5 + $0x378] sm:$0xff]  ;;  %v716_v4 = vpack.c.bf16 %v128_v0, %v127_v63  ;;  %p800_p2 = scmp.ne.s32.totalorder %s472_s12, %s799_s2  ;;  %p805_p4 = scmp.lt.s32.totalorder %s799_s2, %s799_s2 }
  0x54   :  { %729 = vmatpush3.bf16.msra.mxu1 %v728_v11  ;;  %v748_v5 = vpack.c.bf16 %v160_v3, %v159_v2  ;;  %v47_v7 = vld [vmem:[#allocation2 + $0x30] sm:$0xff] }
  0x55   :  { %731 = vmatprep.subr.bf16.mxu1 %v730_v16  ;;  %p806_p5 = por %p805_p4, %p804_p3 }
  0x56   :  { %701 = vmatpush3.bf16.msra.mxu0 %v700_v22 }
  0x57   :  { %703 = vmatprep.subr.bf16.mxu0 %v702_v26  ;;  %p807_p6 = pnand %p806_p5, %p800_p2 }
  0x58   :  { %733 = vmatpush3.bf16.msra.mxu1 %v732_v25 }
  0x59   :  { %735 = vmatprep.subr.bf16.mxu1 %v734_v30 }
  0x5a   :  { %705 = vmatpush3.bf16.msra.mxu0 %v704_v36 }
  0x5b   :  { %707 = vmatprep.subr.bf16.mxu0 %v706_v38 }
  0x5c   :  { %737 = vmatpush3.bf16.msra.mxu1 %v736_v37 }
  0x5d   :  { %739 = vmatprep.subr.bf16.mxu1 %v738_v42 }
  0x5e   :  { %709 = vmatpush3.bf16.msra.mxu0 %v708_v48 }
  0x5f   :  { %711 = vmatprep.subr.bf16.mxu0 %v710_v50 }
  0x60   :  { %741 = vmatpush3.bf16.msra.mxu1 %v740_v49 }
  0x61   :  { %743 = vmatprep.subr.bf16.mxu1 %v742_v54 }
  0x62   :  { %713 = vmatpush3.bf16.msra.mxu0 %v712_v60 }
  0x63   :  { %715 = vmatprep.subr.bf16.mxu0 %v714_v62 }
  0x64   :  { %745 = vmatpush3.bf16.msra.mxu1 %v744_v61 }
  0x65   :  { %747 = vmatprep.subr.bf16.mxu1 %v746_v1 }
  0x66   :  { %717 = vmatpush3.bf16.msra.mxu0 %v716_v4 }
  0x68   :  { %749 = vmatpush3.bf16.msra.mxu1 %v748_v5 }
  0x69   :  { %389 = vmatmul.mubr.f32.vlgmr.msra.gmra.mrb[2].mxu0 %v45_v6 }
  0x6b   :  { %459 = vmatmul.mubr.f32.vlgmr.msra.gmra.mrb[2].mxu1 %v47_v7 }
 0x11c   :  { %v514_v8 = vpop.f32.mrb[0].mxu0 }
 0x11d   :  { %v515_v10 = vpop.f32.mrb[1].mxu0 }
 0x11e   :  { %v549_v11 = vpop.f32.mrb[0].mxu1  ;;  %v516_v12 = vadd.f32 %v515_v10, %v514_v8 }
 0x11f   :  { %v550_v13 = vpop.f32.mrb[1].mxu1 }
 0x120   :  { %v551_v14 = vadd.f32 %v550_v13, %v549_v11  ;;  %v251_v15 = vadd.f32 %v516_v12, %v481_v9 }
 0x122   :  { %v321_v16 = vadd.f32 %v551_v14, %v251_v15 }
 0x13c   :  { %v584_v17 = vpop.f32.mrb[2].mxu0 }
 0x13d   :  { %v585_v18 = vpop.f32.mrb[3].mxu0 }
 0x13e   :  { %v619_v19 = vpop.f32.mrb[2].mxu1  ;;  %v586_v20 = vadd.f32 %v585_v18, %v584_v17 }
 0x13f   :  { %v620_v21 = vpop.f32.mrb[3].mxu1 }
 0x140   :  { %v621_v22 = vadd.f32 %v620_v21, %v619_v19  ;;  %v391_v23 = vadd.f32 %v586_v20, %v321_v16 }
 0x142   :  { %v461_v24 = vadd.f32 %v621_v22, %v391_v23 }
 0x144   :  { %464 = vst [vmem:[#allocation7] sm:$0xff] %v461_v24 }
 0x145   :  { %810 = shalt.err (!%p807_p6)
}
 0x146   :  { %s811_s15 = scalar_lea.hbm %s901_s3, 128 }
 0x147   :  { %p812_p7 = scmp.ne.s32.totalorder %s901_s3, %s811_s15  ;;  %p815_p8 = scmp.lt.u32.totalorder %s811_s15, %s901_s3 }
 0x149   :  { %p817_p9 = pnand %p815_p8, %p812_p7 }
 0x14b   :  { %820 = shalt.err (!%p817_p9)
}
 0x14c   :  { %474 = dma.vmem_to_hbm [thread:$0]  %s472_s12, 128, %s901_s3, [#allocation4]  }
 0x14d   :  { %825 = dma.done.wait [#allocation4], 128  }
 0x14e   :  { %826 = vsyncadd [#allocation4], 4294967168 }
 0x14f   :  { %478 = vsyncpa [#allocation3], 1 }
 0x150   :  { %479 = vsyncpa [#allocation6], 1 }
 0x151   :  { %480 = vsyncpa [#allocation4], 1 }

</bundles_post_ra>
